<compile_context>
chip_gen: v6e
topology: v6e:2x2x1
jax: 0.10.0
libtpu: 0.0.40
codegen_flags: <defaults>
</compile_context>

<pallas_src>
import functools

import jax
import jax.numpy as jnp
from jax.experimental import pallas as pl
from jax.experimental.pallas import tpu as pltpu


def _fused_mlp_kernel(x_ref, *refs, n_layers, negative_slope):
    """refs = (w0, b0, w1, b1, ..., w_{L-1}, b_{L-1}, o_ref)."""
    o_ref = refs[-1]
    wb_refs = refs[:-1]

    # All intermediates live in vregs/VMEM; only o_ref goes back to HBM.
    h = x_ref[...].astype(jnp.float32)
    for li in range(n_layers):
        w = wb_refs[2 * li][...]
        b = wb_refs[2 * li + 1][...]            # (1, N): broadcasts over rows
        h = jnp.dot(h, w.astype(jnp.float32), preferred_element_type=jnp.float32)
        h = h + b.astype(jnp.float32)
        if li < n_layers - 1:                    # hidden blocks: LeakyReLU(0.2)
            h = jnp.where(h > 0, h, negative_slope * h)
    o_ref[...] = h.astype(o_ref.dtype)


def _batch_tile(batch):
    """Largest power-of-two batch tile (multiple of 8, up to 512) dividing batch."""
    for tm in (512, 256, 128, 64, 32, 16, 8):
        if batch % tm == 0:
            return tm
    return batch  # tiny / odd batch: single full-array block (still legal tiling)


def mlp_forward(x, params, *, negative_slope=0.2):
    """MLP.forward: flatten, hidden Linear+LeakyReLU blocks, final Linear —
    all fused into ONE pallas_call."""
    batch = x.shape[0]
    h = x.reshape(batch, -1)                     # x.view(x.size(0), -1) — glue, plain JAX
    k0 = h.shape[1]
    n_layers = len(params)
    out_dim = params[-1][0].shape[1]

    tm = _batch_tile(batch)
    grid = (batch // tm,)

    in_specs = [pl.BlockSpec((tm, k0), lambda i: (i, 0))]
    flat_wb = []
    flops = 0
    bytes_accessed = h.size * h.dtype.itemsize
    for (w, b) in params:
        k_in, n_out = w.shape
        b2 = b.reshape(1, n_out)
        # Full-array weight/bias blocks, resident in VMEM across all batch steps.
        in_specs.append(pl.BlockSpec((k_in, n_out), lambda i: (0, 0)))
        in_specs.append(pl.BlockSpec((1, n_out), lambda i: (0, 0)))
        flat_wb += [w, b2]
        flops += 2 * batch * k_in * n_out
        bytes_accessed += w.size * w.dtype.itemsize + b2.size * b2.dtype.itemsize
    bytes_accessed += batch * out_dim * h.dtype.itemsize

    kernel = functools.partial(
        _fused_mlp_kernel, n_layers=n_layers, negative_slope=negative_slope
    )
    return pl.pallas_call(
        kernel,
        out_shape=jax.ShapeDtypeStruct((batch, out_dim), x.dtype),
        grid=grid,
        in_specs=in_specs,
        out_specs=pl.BlockSpec((tm, out_dim), lambda i: (i, 0)),
        compiler_params=pltpu.CompilerParams(
            dimension_semantics=("parallel",)    # batch axis shards across TCs
        ),
        cost_estimate=pl.CostEstimate(
            flops=flops, transcendentals=0, bytes_accessed=bytes_accessed
        ),
    )(h, *flat_wb)


def init_mlp_params(key, dims, out_dim, dtype=jnp.float32):
    """Synthetic nn.Linear parameters; weights stored as (in, out) — transpose of
    PyTorch's (out, in) storage, so forward is h @ W + b."""
    all_dims = list(dims) + [out_dim]
    params = []
    for i in range(len(all_dims) - 1):
        key, kw, kb = jax.random.split(key, 3)
        fan_in, fan_out = all_dims[i], all_dims[i + 1]
        bound = 1.0 / jnp.sqrt(fan_in)
        w = jax.random.uniform(kw, (fan_in, fan_out), dtype, -bound, bound)
        b = jax.random.uniform(kb, (fan_out,), dtype, -bound, bound)
        params.append((w, b))
    return params


def mlp_reference(x, params, *, negative_slope=0.2):
    h = x.reshape(x.shape[0], -1)
    n_layers = len(params)
    for li, (w, b) in enumerate(params):
        h = h @ w + b
        if li < n_layers - 1:
            h = jnp.where(h > 0, h, negative_slope * h)
    return h


if __name__ == "__main__":
    # cfg.MODEL.MOTION_DECODER.MLP_DIM and out_dim (small, synthetic)
    MLP_DIM = [64, 48, 32]
    OUT_DIM = 16

    key = jax.random.PRNGKey(0)
    kx, kx2, kp = jax.random.split(key, 3)
    params = init_mlp_params(kp, MLP_DIM, OUT_DIM)

    # 1) Tiny batch (typical module use): (2, 4, 16) -> flatten -> (2, 64)
    x_small = jax.random.normal(kx, (2, 4, 16), dtype=jnp.float32)
    out_small = jax.block_until_ready(mlp_forward(x_small, params))
    ref_small = mlp_reference(x_small, params)
    assert out_small.shape == (2, OUT_DIM), out_small.shape
    assert jnp.allclose(out_small, ref_small, atol=1e-5, rtol=1e-5), "small-batch mismatch"

    # 2) Larger batch exercising the tiled / parallel batch grid axis.
    x_large = jax.random.normal(kx2, (512, 4, 16), dtype=jnp.float32)
    out_large = jax.block_until_ready(mlp_forward(x_large, params))
    ref_large = mlp_reference(x_large, params)
    assert out_large.shape == (512, OUT_DIM), out_large.shape
    assert jnp.allclose(out_large, ref_large, atol=1e-5, rtol=1e-5), "large-batch mismatch"

    print("KERNEL_OK")
</pallas_src>

<mosaic_0001>
module attributes {stable_mosaic.version = 11 : i64} {
  func.func @_fused_mlp_kernel(%arg0: i32, %arg1: memref<2x64xf32, #tpu.memory_space<vmem>>, %arg2: memref<64x48xf32, #tpu.memory_space<vmem>>, %arg3: memref<1x48xf32, #tpu.memory_space<vmem>>, %arg4: memref<48x32xf32, #tpu.memory_space<vmem>>, %arg5: memref<1x32xf32, #tpu.memory_space<vmem>>, %arg6: memref<32x16xf32, #tpu.memory_space<vmem>>, %arg7: memref<1x16xf32, #tpu.memory_space<vmem>>, %arg8: memref<2x16xf32, #tpu.memory_space<vmem>>) attributes {dimension_semantics = [#tpu.dimension_semantics<parallel>], iteration_bounds = array<i64: 1>, scalar_prefetch = 0 : i64, scratch_operands = 0 : i64, tpu.core_type = #tpu.core_type<tc>, window_params = [{transform_indices = @transform_0, window_bounds = array<i64: 2, 64>}, {pipeline_mode = #tpu.pipeline_mode<synchronous>, transform_indices = @transform_1, window_bounds = array<i64: 64, 48>}, {pipeline_mode = #tpu.pipeline_mode<synchronous>, transform_indices = @transform_2, window_bounds = array<i64: 1, 48>}, {pipeline_mode = #tpu.pipeline_mode<synchronous>, transform_indices = @transform_3, window_bounds = array<i64: 48, 32>}, {pipeline_mode = #tpu.pipeline_mode<synchronous>, transform_indices = @transform_4, window_bounds = array<i64: 1, 32>}, {pipeline_mode = #tpu.pipeline_mode<synchronous>, transform_indices = @transform_5, window_bounds = array<i64: 32, 16>}, {pipeline_mode = #tpu.pipeline_mode<synchronous>, transform_indices = @transform_6, window_bounds = array<i64: 1, 16>}, {transform_indices = @transform_7, window_bounds = array<i64: 2, 16>}]} {
    %c0 = arith.constant 0 : index
    %c0_0 = arith.constant 0 : index
    %0 = vector.load %arg1[%c0, %c0_0] : memref<2x64xf32, #tpu.memory_space<vmem>>, vector<2x64xf32>
    %c0_1 = arith.constant 0 : index
    %c0_2 = arith.constant 0 : index
    %1 = vector.load %arg2[%c0_1, %c0_2] : memref<64x48xf32, #tpu.memory_space<vmem>>, vector<64x48xf32>
    %c0_3 = arith.constant 0 : index
    %c0_4 = arith.constant 0 : index
    %2 = vector.load %arg3[%c0_3, %c0_4] : memref<1x48xf32, #tpu.memory_space<vmem>>, vector<1x48xf32>
    %cst = arith.constant dense<0.000000e+00> : vector<2x48xf32>
    %3 = tpu.matmul %0, %1, %cst {dimension_numbers = #tpu.dot_dimension_numbers<[1], [0], [0], [1], [0, 0, 1, 1], [], []>} : vector<2x64xf32>, vector<64x48xf32>, vector<2x48xf32> -> vector<2x48xf32>
    %4 = vector.broadcast %2 : vector<1x48xf32> to vector<2x48xf32>
    %5 = arith.addf %3, %4 : vector<2x48xf32>
    %cst_5 = arith.constant 0.000000e+00 : f32
    %6 = vector.broadcast %cst_5 : f32 to vector<2x48xf32>
    %7 = arith.cmpf ogt, %5, %6 : vector<2x48xf32>
    %cst_6 = arith.constant 2.000000e-01 : f32
    %8 = vector.broadcast %cst_6 : f32 to vector<2x48xf32>
    %9 = arith.mulf %8, %5 : vector<2x48xf32>
    %10 = arith.select %7, %5, %9 : vector<2x48xi1>, vector<2x48xf32>
    %c0_7 = arith.constant 0 : index
    %c0_8 = arith.constant 0 : index
    %11 = vector.load %arg4[%c0_7, %c0_8] : memref<48x32xf32, #tpu.memory_space<vmem>>, vector<48x32xf32>
    %c0_9 = arith.constant 0 : index
    %c0_10 = arith.constant 0 : index
    %12 = vector.load %arg5[%c0_9, %c0_10] : memref<1x32xf32, #tpu.memory_space<vmem>>, vector<1x32xf32>
    %cst_11 = arith.constant dense<0.000000e+00> : vector<2x32xf32>
    %13 = tpu.matmul %10, %11, %cst_11 {dimension_numbers = #tpu.dot_dimension_numbers<[1], [0], [0], [1], [0, 0, 1, 1], [], []>} : vector<2x48xf32>, vector<48x32xf32>, vector<2x32xf32> -> vector<2x32xf32>
    %14 = vector.broadcast %12 : vector<1x32xf32> to vector<2x32xf32>
    %15 = arith.addf %13, %14 : vector<2x32xf32>
    %cst_12 = arith.constant 0.000000e+00 : f32
    %16 = vector.broadcast %cst_12 : f32 to vector<2x32xf32>
    %17 = arith.cmpf ogt, %15, %16 : vector<2x32xf32>
    %cst_13 = arith.constant 2.000000e-01 : f32
    %18 = vector.broadcast %cst_13 : f32 to vector<2x32xf32>
    %19 = arith.mulf %18, %15 : vector<2x32xf32>
    %20 = arith.select %17, %15, %19 : vector<2x32xi1>, vector<2x32xf32>
    %c0_14 = arith.constant 0 : index
    %c0_15 = arith.constant 0 : index
    %21 = vector.load %arg6[%c0_14, %c0_15] : memref<32x16xf32, #tpu.memory_space<vmem>>, vector<32x16xf32>
    %c0_16 = arith.constant 0 : index
    %c0_17 = arith.constant 0 : index
    %22 = vector.load %arg7[%c0_16, %c0_17] : memref<1x16xf32, #tpu.memory_space<vmem>>, vector<1x16xf32>
    %cst_18 = arith.constant dense<0.000000e+00> : vector<2x16xf32>
    %23 = tpu.matmul %20, %21, %cst_18 {dimension_numbers = #tpu.dot_dimension_numbers<[1], [0], [0], [1], [0, 0, 1, 1], [], []>} : vector<2x32xf32>, vector<32x16xf32>, vector<2x16xf32> -> vector<2x16xf32>
    %24 = vector.broadcast %22 : vector<1x16xf32> to vector<2x16xf32>
    %25 = arith.addf %23, %24 : vector<2x16xf32>
    %c0_19 = arith.constant 0 : index
    %c0_20 = arith.constant 0 : index
    %26 = vector.load %arg8[%c0_19, %c0_20] : memref<2x16xf32, #tpu.memory_space<vmem>>, vector<2x16xf32>
    tpu.vector_store %arg8[%c0_19, %c0_20], %25 {strides = array<i32>} : memref<2x16xf32, #tpu.memory_space<vmem>>, vector<2x16xf32>,
    return
  }
  func.func @transform_0(%arg0: i32) -> (i32, i32) {
    %c0_i32 = arith.constant 0 : i32
    %c0_i32_0 = arith.constant 0 : i32
    return %arg0, %c0_i32 : i32, i32
  }
  func.func @transform_1(%arg0: i32) -> (i32, i32) {
    %c0_i32 = arith.constant 0 : i32
    %c0_i32_0 = arith.constant 0 : i32
    %c0_i32_1 = arith.constant 0 : i32
    return %c0_i32, %c0_i32_0 : i32, i32
  }
  func.func @transform_2(%arg0: i32) -> (i32, i32) {
    %c0_i32 = arith.constant 0 : i32
    %c0_i32_0 = arith.constant 0 : i32
    %c0_i32_1 = arith.constant 0 : i32
    return %c0_i32, %c0_i32_0 : i32, i32
  }
  func.func @transform_3(%arg0: i32) -> (i32, i32) {
    %c0_i32 = arith.constant 0 : i32
    %c0_i32_0 = arith.constant 0 : i32
    %c0_i32_1 = arith.constant 0 : i32
    return %c0_i32, %c0_i32_0 : i32, i32
  }
  func.func @transform_4(%arg0: i32) -> (i32, i32) {
    %c0_i32 = arith.constant 0 : i32
    %c0_i32_0 = arith.constant 0 : i32
    %c0_i32_1 = arith.constant 0 : i32
    return %c0_i32, %c0_i32_0 : i32, i32
  }
  func.func @transform_5(%arg0: i32) -> (i32, i32) {
    %c0_i32 = arith.constant 0 : i32
    %c0_i32_0 = arith.constant 0 : i32
    %c0_i32_1 = arith.constant 0 : i32
    return %c0_i32, %c0_i32_0 : i32, i32
  }
  func.func @transform_6(%arg0: i32) -> (i32, i32) {
    %c0_i32 = arith.constant 0 : i32
    %c0_i32_0 = arith.constant 0 : i32
    %c0_i32_1 = arith.constant 0 : i32
    return %c0_i32, %c0_i32_0 : i32, i32
  }
  func.func @transform_7(%arg0: i32) -> (i32, i32) {
    %c0_i32 = arith.constant 0 : i32
    %c0_i32_0 = arith.constant 0 : i32
    return %arg0, %c0_i32 : i32, i32
  }
}

</mosaic_0001>

<bundles_post_ra>
// kernel: tpu_custom_call.1
= control target key start
LH: loop header
LB: loop body
LE: loop exit
PB: predicated region body
PF: predicated region fallthrough
CT: control target
= control target key end

     0   :  { %v408_v1 = vmov 0.0   ;;  %vm409_vm0 = vmmov 0   ;;  %s544_s0 = inlined_call_operand.vmem [shape: f32[2,64], index: 0, kind: input, shape index: {}]   ;;  %s545_s1 = inlined_call_operand.vmem [shape: f32[64,48], index: 1, kind: input, shape index: {}]   ;;  %s546_s2 = inlined_call_operand.vmem [shape: f32[1,48], index: 2, kind: input, shape index: {}]   ;;  %s547_s3 = inlined_call_operand.vmem [shape: f32[48,32], index: 3, kind: input, shape index: {}]   ;;  %s548_s4 = inlined_call_operand.vmem [shape: f32[1,32], index: 4, kind: input, shape index: {}]   ;;  %s549_s5 = inlined_call_operand.vmem [shape: f32[32,16], index: 5, kind: input, shape index: {}]   ;;  %s550_s6 = inlined_call_operand.vmem [shape: f32[1,16], index: 6, kind: input, shape index: {}]   ;;  %s551_s7 = inlined_call_operand.hbm [shape: f32[2,16], index: 7, kind: output, shape index: {}]  }
   0x1   :  { %v35_v0 = vld [vmem:[%s545_s1 + $0x38] sm:$0xff]  ;;  %338 = vmatprep.subr.mxu0 %v408_v1  ;;  %v34_v2 = vld [vmem:[%s545_s1 + $0x30] sm:$0xff]  ;;  %354 = vmatprep.mubr.msk.f32.mxu0 %vm409_vm0, %v408_v1  ;;  %v33_v3 = vld [vmem:[%s545_s1 + $0x28] sm:$0xff] }
   0x2   :  { %339 = vmatpush3.msra.mxu0 %v35_v0  ;;  %357 = vmatprep.subr.mxu1 %v408_v1  ;;  %v125_v4 = vld [vmem:[%s547_s3 + $0x28] sm:$0xff]  ;;  %v124_v5 = vld [vmem:[%s547_s3 + $0x20] sm:$0xff] }
   0x3   :  { %340 = vmatprep.subr.mxu0 %v408_v1  ;;  %369 = vmatprep.mubr.msk.f32.mxu1 %vm409_vm0, %v408_v1 }
   0x4   :  { %341 = vmatpush3.msra.mxu0 %v34_v2  ;;  %358 = vmatpush3.msra.mxu1 %v125_v4 }
   0x5   :  { %12 = vsyncpa [#allocation3], 0  ;;  %342 = vmatprep.subr.mxu0 %v408_v1  ;;  %v32_v6 = vld [vmem:[%s545_s1 + $0x20] sm:$0xff]  ;;  %359 = vmatprep.subr.mxu1 %v408_v1  ;;  %v123_v7 = vld [vmem:[%s547_s3 + $0x18] sm:$0xff]  ;;  %vm43_vm1 = vcmask 523264   ;;  %vm133_vm3 = vcmask 392192  }
   0x6   :  { %343 = vmatpush3.msra.mxu0 %v33_v3  ;;  %360 = vmatpush3.msra.mxu1 %v124_v5  ;;  %v31_v8 = vld [vmem:[%s545_s1 + $0x18] sm:$0xff]  ;;  %v30_v9 = vld [vmem:[%s545_s1 + $0x10] sm:$0xff]  ;;  %v29_v10 = vld [vmem:[%s545_s1 + $0x8] sm:$0xff]  ;;  %vm221_vm5 = vcmask 261120   ;;  %s410_s18 = smov [#allocation2]   ;;  %vm295_vm6 = vcmask 123904  }
   0x7   :  { %344 = vmatprep.subr.mxu0 %v408_v1  ;;  %361 = vmatprep.subr.mxu1 %v408_v1  ;;  %v28_v11 = vld [vmem:[%s545_s1] sm:$0xff]  ;;  %v122_v13 = vld [vmem:[%s547_s3 + $0x10] sm:$0xff]  ;;  %v121_v14 = vld [vmem:[%s547_s3 + $0x8] sm:$0xff]  ;;  %s303_s19 = sshll.u32 %s410_s18, 4  ;;  %s304_s19 = int_to_ptr.vmem [resolvable:$true] %s303_s19 }
   0x8   :  { %345 = vmatpush3.msra.mxu0 %v32_v6  ;;  %362 = vmatpush3.msra.mxu1 %v123_v7  ;;  %v27_v12 = vld [vmem:[%s544_s0] sm:$0x3]  ;;  %v213_v21 = vld [vmem:[%s549_s5 + $0x18] sm:$0xff]  ;;  %v212_v23 = vld [vmem:[%s549_s5 + $0x10] sm:$0xff]  ;;  %p391_p1 = scmp.lt.s32.totalorder %s304_s19, %s304_s19 }
   0x9   :  { %346 = vmatprep.subr.mxu0 %v408_v1  ;;  %363 = vmatprep.subr.mxu1 %v408_v1  ;;  %v120_v15 = vld [vmem:[%s547_s3] sm:$0xff]  ;;  %v211_v24 = vld [vmem:[%s549_s5 + $0x8] sm:$0xff] }
   0xa   :  { %347 = vmatpush3.msra.mxu0 %v31_v8  ;;  %364 = vmatpush3.msra.mxu1 %v122_v13  ;;  %v311_v16 = vld [vmem:[%s546_s2] ss:$0 sm:$0xff] }
   0xb   :  { %348 = vmatprep.subr.mxu0 %v408_v1  ;;  %365 = vmatprep.subr.mxu1 %v408_v1  ;;  %v210_v25 = vld [vmem:[%s549_s5] sm:$0xff] }
   0xc   :  { %349 = vmatpush3.msra.mxu0 %v30_v9  ;;  %366 = vmatpush3.msra.mxu1 %v121_v14  ;;  %v313_v26 = vld [vmem:[%s548_s4] ss:$0 sm:$0xff]  ;;  %s386_s4 = scalar_lea.vmem %s304_s19, 32 }
   0xd   :  { %350 = vmatprep.subr.mxu0 %v408_v1  ;;  %367 = vmatprep.subr.mxu1 %v408_v1  ;;  %v315_v32 = vld [vmem:[%s550_s6] ss:$0 sm:$0xff]  ;;  %p387_p0 = scmp.ne.s32.totalorder %s304_s19, %s386_s4  ;;  %p392_p2 = scmp.lt.s32.totalorder %s386_s4, %s386_s4 }
   0xe   :  { %351 = vmatpush3.msra.mxu0 %v29_v10  ;;  %368 = vmatpush3.msra.mxu1 %v120_v15 }
   0xf   :  { %352 = vmatprep.subr.mxu0 %v408_v1  ;;  %372 = vmatprep.subr.mxu1 %v408_v1  ;;  %p393_p3 = por %p392_p2, %p391_p1 }
  0x10   :  { %353 = vmatpush3.msra.mxu0 %v28_v11 }
  0x11   :  { %355 = vmatmul.mubr.msk.f32.vlgmr.msra.gmra.mxu0 %vm43_vm1, %v27_v12  ;;  %p394_p4 = pnand %p393_p3, %p387_p0 }
  0xd1   :  { %v113_v17 = vpop.f32.mrf.mxu0 }
  0xd2   :  { %v114_v18 = vadd.f32 %v311_v16, %v113_v17 }
  0xd3   :  { %v356_v19 = vpop.f32.mrf.mxu0 }
  0xd4   :  { %vm117_vm2 = vcmp.gt.f32.partialorder %v114_v18, 0.0  ;;  %v118_v20 = vmul.f32 0.2, %v114_v18 }
  0xd6   :  { %v119_v22 = vsel %vm117_vm2, %v114_v18, %v118_v20 }
  0xd7   :  { %370 = vmatmul.mubr.msk.f32.vlgmr.msra.gmra.mxu1 %vm133_vm3, %v119_v22 }
  0xd8   :  { %373 = vmatpush3.msra.mxu1 %v213_v21  ;;  %380 = vmatprep.mubr.msk.f32.mxu1 %vm409_vm0, %v408_v1 }
  0xd9   :  { %374 = vmatprep.subr.mxu1 %v408_v1 }
  0xda   :  { %375 = vmatpush3.msra.mxu1 %v212_v23 }
  0xdb   :  { %376 = vmatprep.subr.mxu1 %v408_v1 }
  0xdc   :  { %377 = vmatpush3.msra.mxu1 %v211_v24 }
  0xdd   :  { %378 = vmatprep.subr.mxu1 %v408_v1 }
  0xde   :  { %379 = vmatpush3.msra.mxu1 %v210_v25 }
 0x197   :  { %v203_v27 = vpop.f32.mrf.mxu1 }
 0x198   :  { %v204_v28 = vadd.f32 %v313_v26, %v203_v27 }
 0x199   :  { %v371_v29 = vpop.f32.mrf.mxu1 }
 0x19a   :  { %vm207_vm4 = vcmp.gt.f32.partialorder %v204_v28, 0.0  ;;  %v208_v30 = vmul.f32 0.2, %v204_v28 }
 0x19c   :  { %v209_v31 = vsel %vm207_vm4, %v204_v28, %v208_v30 }
 0x19d   :  { %381 = vmatmul.mubr.msk.f32.vlgmr.msra.gmra.mxu1 %vm221_vm5, %v209_v31 }
 0x25d   :  { %v291_v33 = vpop.f32.mrf.mxu1 }
 0x25e   :  { %v292_v34 = vadd.f32 %v315_v32, %v291_v33 }
 0x25f   :  { %v382_v35 = vpop.f32.mrf.mxu1 }
 0x260   :  { %296 = vst.msk [vmem:[#allocation2] sm:$0x3] %vm295_vm6, %v292_v34 }
 0x261   :  { %397 = shalt.err (!%p394_p4)
}
 0x262   :  { %306 = dma.vmem_to_hbm [thread:$0]  %s304_s19, 32, %s551_s7, [#allocation3]  }
 0x263   :  { %406 = dma.done.wait [#allocation3], 32  }
 0x264   :  { %407 = vsyncadd [#allocation3], 4294967264 }
 0x265   :  { %310 = vsyncpa [#allocation3], 1 }

</bundles_post_ra>
